<compile_context>
chip_gen: v5e
topology: v5e:2x2
jax: 0.10.0
libtpu: 0.0.40
codegen_flags: <defaults>
</compile_context>

<pallas_src>
import jax
import jax.numpy as jnp
from jax import lax
from jax.experimental import pallas as pl
from jax.experimental.pallas import tpu as pltpu


def _make_kernel(use_vpu_tail: bool):
    def kernel(xT_ref, w1_ref, w23_ref, o_ref):
        xT = xT_ref[...]      # (input, TB)    compute dtype (f32 or bf16)
        w1 = w1_ref[...]      # (hidden, input) PyTorch (out_features, in_features) layout
        w23 = w23_ref[...]    # (hidden, 1)     folded fc2+fc weight, as a column

        # fc1: h = W1 @ xT -> (hidden, TB). Standard (M,K)x(K,N) contraction, f32 acc.
        h = lax.dot_general(w1, xT, (((1,), (0,)), ((), ())),
                            preferred_element_type=jnp.float32)
        h = jnp.maximum(h, 0.0)                                   # ReLU (VPU, f32)

        if use_vpu_tail:
            # Tiny hidden: an M=1 matmul wastes 7/8 MXU sublanes; broadcast-multiply
            # + sublane reduce runs on VPU/XLU slots that are otherwise idle.
            out = jnp.sum(w23.astype(jnp.float32) * h, axis=0, keepdims=True)
        else:
            # Production-sized hidden: keep the tail on the MXU.
            out = lax.dot_general(w23, h, (((0,), (0,)), ((), ())),
                                  preferred_element_type=jnp.float32)
        o_ref[...] = out.astype(o_ref.dtype)                      # (1, TB) lane-dense store
    return kernel


def _pick_batch_tile(batch: int) -> int:
    # Lane-dense tiles (multiple of 128). 2048 rows amortizes per-grid-step overhead on
    # v5e/v6e and fits comfortably inside the v7x 64 MiB/TC VMEM budget at these feature
    # sizes; shrink for small batches so the padded grid keeps >= 2 steps where possible
    # (keeps pipelining and the v7x dual-TC split engaged).
    tb = 2048
    while tb > 128 and pl.cdiv(batch, tb) < 2:
        tb //= 2
    return tb


def toy_model_forward(x, w1, w2, wfc, *, compute_dtype=jnp.float32, tb=None):
    """x: (B, input); w1: (hidden, input); w2: (input, hidden); wfc: (1, input)."""
    B, input_size = x.shape
    hidden = w1.shape[0]

    # Fold fc2 (row-parallel) + final fc: (h @ W2.T) @ Wfc.T == h @ (Wfc @ W2).T.
    # Stored as a column so the kernel broadcasts it along the (hidden, TB) lanes.
    w23_col = (wfc @ w2).reshape(hidden, 1)                        # (hidden, 1), f32

    # Batch-on-lanes: stream x transposed; pad the batch to a whole number of tiles.
    if tb is None:
        tb = _pick_batch_tile(B)
    n_tiles = pl.cdiv(B, tb)
    b_pad = n_tiles * tb
    xT = x.T                                                       # (input, B)
    if b_pad != B:
        xT = jnp.pad(xT, ((0, 0), (0, b_pad - B)))                 # zero cols -> zero outputs

    # Optional bf16 streaming (halves HBM bytes / resident-weight VMEM); f32 accumulation
    # is preserved inside the kernel via preferred_element_type.
    xT = xT.astype(compute_dtype)
    w1c = w1.astype(compute_dtype)
    w23c = w23_col.astype(compute_dtype)

    itemsize = jnp.dtype(compute_dtype).itemsize
    cost = pl.CostEstimate(
        flops=2 * b_pad * input_size * hidden + 2 * b_pad * hidden,
        transcendentals=0,
        bytes_accessed=(b_pad * input_size * itemsize
                        + (hidden * input_size + hidden) * itemsize
                        + b_pad * 4),
    )
    kernel = _make_kernel(use_vpu_tail=(hidden <= 256))

    def run(weight_pipeline_mode):
        wkw = {} if weight_pipeline_mode is None else {"pipeline_mode": weight_pipeline_mode}
        return pl.pallas_call(
            kernel,
            out_shape=jax.ShapeDtypeStruct((1, b_pad), jnp.float32),
            grid=(n_tiles,),
            in_specs=[
                pl.BlockSpec((input_size, tb), lambda i: (0, i)),            # x: streamed per tile
                pl.BlockSpec((hidden, input_size), lambda i: (0, 0), **wkw),  # W1: VMEM-resident
                pl.BlockSpec((hidden, 1), lambda i: (0, 0), **wkw),          # W23: VMEM-resident
            ],
            out_specs=pl.BlockSpec((1, tb), lambda i: (0, i)),               # lane-dense output
            compiler_params=pltpu.CompilerParams(
                dimension_semantics=("parallel",),    # batch tiles -> both TCs on v7x
                vmem_limit_bytes=32 << 20,            # above the 16 MiB v5e scoped default
            ),
            cost_estimate=cost,
        )(xT, w1c, w23c)

    try:
        out_lane = run(pl.Buffered(1))   # constant-index weights: single buffer
    except Exception:
        out_lane = run(None)             # fallback: default double-buffering

    # Layout plumbing back to the module's (B, 1) output shape (drop batch padding).
    return out_lane[:, :B].T


def make_params(input_size=8, hidden_size=32):
    # Deterministic init mirroring the PyTorch module at rank=0 / world_size=1
    # (0.5**rank == 1.0 inside the sin/cos arguments).
    w1 = jnp.sin(jnp.arange(hidden_size * input_size, dtype=jnp.float32)
                 .reshape(hidden_size, input_size)) * 0.1           # ColumnParallelLinear.weight
    w2 = jnp.cos(jnp.arange(input_size * hidden_size, dtype=jnp.float32)
                 .reshape(input_size, hidden_size)) * 0.1           # RowParallelLinear.weight
    wfc = jnp.sin(jnp.arange(input_size, dtype=jnp.float32)).reshape(1, input_size) * 0.1
    return w1, w2, wfc


def reference_forward(x, w1, w2, wfc):
    # Unfused pure-JAX reference, matching the PyTorch forward op-for-op.
    h = jnp.maximum(x @ w1.T, 0.0)
    y = h @ w2.T
    return y @ wfc.T


if __name__ == "__main__":
    input_size, hidden_size = 8, 32
    w1, w2, wfc = make_params(input_size, hidden_size)

    # 1) Toy batch, f32: tight tolerance vs. the op-for-op reference.
    x_small = jax.random.normal(jax.random.PRNGKey(0), (2, input_size), dtype=jnp.float32)
    out = jax.block_until_ready(toy_model_forward(x_small, w1, w2, wfc))
    ref = reference_forward(x_small, w1, w2, wfc)
    assert out.shape == (2, 1), out.shape
    assert jnp.allclose(out, ref, atol=1e-5, rtol=1e-5), (out, ref)

    # 2) Non-multiple-of-128 batch, f32: exercises the padding + multi-step grid path.
    x_big = jax.random.normal(jax.random.PRNGKey(1), (300, input_size), dtype=jnp.float32)
    out_big = jax.block_until_ready(toy_model_forward(x_big, w1, w2, wfc))
    ref_big = reference_forward(x_big, w1, w2, wfc)
    assert out_big.shape == (300, 1), out_big.shape
    assert jnp.allclose(out_big, ref_big, atol=1e-5, rtol=1e-5)

    # 3) bf16 streaming path (production setting on v5e/v6e/v7x): f32 accumulation,
    #    looser tolerance vs. the f32 reference.
    out_bf16 = jax.block_until_ready(
        toy_model_forward(x_big, w1, w2, wfc, compute_dtype=jnp.bfloat16))
    assert jnp.allclose(out_bf16, ref_big, atol=3e-2, rtol=5e-2)

    print("KERNEL_OK")
</pallas_src>

<mosaic_0001>
module attributes {stable_mosaic.version = 11 : i64} {
  func.func @kernel(%arg0: i32, %arg1: memref<8x128xf32, #tpu.memory_space<vmem>>, %arg2: memref<32x8xf32, #tpu.memory_space<vmem>>, %arg3: memref<32x1xf32, #tpu.memory_space<vmem>>, %arg4: memref<1x128xf32, #tpu.memory_space<vmem>>) attributes {dimension_semantics = [#tpu.dimension_semantics<parallel>], iteration_bounds = array<i64: 1>, scalar_prefetch = 0 : i64, scratch_operands = 0 : i64, tpu.core_type = #tpu.core_type<tc>, window_params = [{transform_indices = @transform_0, window_bounds = array<i64: 8, 128>}, {pipeline_mode = #tpu.pipeline_mode<synchronous>, transform_indices = @transform_1, window_bounds = array<i64: 32, 8>}, {pipeline_mode = #tpu.pipeline_mode<synchronous>, transform_indices = @transform_2, window_bounds = array<i64: 32, 1>}, {transform_indices = @transform_3, window_bounds = array<i64: 1, 128>}]} {
    %c0 = arith.constant 0 : index
    %c0_0 = arith.constant 0 : index
    %0 = vector.load %arg1[%c0, %c0_0] : memref<8x128xf32, #tpu.memory_space<vmem>>, vector<8x128xf32>
    %c0_1 = arith.constant 0 : index
    %c0_2 = arith.constant 0 : index
    %1 = vector.load %arg2[%c0_1, %c0_2] : memref<32x8xf32, #tpu.memory_space<vmem>>, vector<32x8xf32>
    %c0_3 = arith.constant 0 : index
    %c0_4 = arith.constant 0 : index
    %2 = vector.load %arg3[%c0_3, %c0_4] : memref<32x1xf32, #tpu.memory_space<vmem>>, vector<32x1xf32>
    %cst = arith.constant dense<0.000000e+00> : vector<32x128xf32>
    %3 = tpu.matmul %1, %0, %cst {dimension_numbers = #tpu.dot_dimension_numbers<[1], [0], [0], [1], [0, 0, 1, 1], [], []>} : vector<32x8xf32>, vector<8x128xf32>, vector<32x128xf32> -> vector<32x128xf32>
    %cst_5 = arith.constant 0.000000e+00 : f32
    %4 = vector.broadcast %cst_5 : f32 to vector<32x128xf32>
    %5 = arith.maximumf %3, %4 : vector<32x128xf32>
    %6 = vector.broadcast %2 : vector<32x1xf32> to vector<32x128xf32>
    %7 = arith.mulf %6, %5 : vector<32x128xf32>
    %cst_6 = arith.constant dense<0.000000e+00> : vector<128xf32>
    %8 = vector.multi_reduction <add>, %7, %cst_6 [0] : vector<32x128xf32> to vector<128xf32>
    %9 = vector.shape_cast %8 : vector<128xf32> to vector<1x128xf32>
    %c0_7 = arith.constant 0 : index
    %c0_8 = arith.constant 0 : index
    %10 = vector.load %arg4[%c0_7, %c0_8] : memref<1x128xf32, #tpu.memory_space<vmem>>, vector<1x128xf32>
    tpu.vector_store %arg4[%c0_7, %c0_8], %9 {strides = array<i32>} : memref<1x128xf32, #tpu.memory_space<vmem>>, vector<1x128xf32>,
    return
  }
  func.func @transform_0(%arg0: i32) -> (i32, i32) {
    %c0_i32 = arith.constant 0 : i32
    %c0_i32_0 = arith.constant 0 : i32
    return %c0_i32, %arg0 : i32, i32
  }
  func.func @transform_1(%arg0: i32) -> (i32, i32) {
    %c0_i32 = arith.constant 0 : i32
    %c0_i32_0 = arith.constant 0 : i32
    %c0_i32_1 = arith.constant 0 : i32
    return %c0_i32, %c0_i32_0 : i32, i32
  }
  func.func @transform_2(%arg0: i32) -> (i32, i32) {
    %c0_i32 = arith.constant 0 : i32
    %c0_i32_0 = arith.constant 0 : i32
    %c0_i32_1 = arith.constant 0 : i32
    return %c0_i32, %c0_i32_0 : i32, i32
  }
  func.func @transform_3(%arg0: i32) -> (i32, i32) {
    %c0_i32 = arith.constant 0 : i32
    %c0_i32_0 = arith.constant 0 : i32
    return %c0_i32, %arg0 : i32, i32
  }
}

module attributes {stable_mosaic.version = 11 : i64} {
  func.func @kernel(%arg0: i32, %arg1: memref<8x128xf32, #tpu.memory_space<vmem>>, %arg2: memref<32x8xf32, #tpu.memory_space<vmem>>, %arg3: memref<32x1xf32, #tpu.memory_space<vmem>>, %arg4: memref<1x128xf32, #tpu.memory_space<vmem>>) attributes {dimension_semantics = [#tpu.dimension_semantics<parallel>], iteration_bounds = array<i64: 1>, scalar_prefetch = 0 : i64, scratch_operands = 0 : i64, tpu.core_type = #tpu.core_type<tc>, window_params = [{transform_indices = @transform_0, window_bounds = array<i64: 8, 128>}, {pipeline_mode = #tpu.pipeline_mode<synchronous>, transform_indices = @transform_1, window_bounds = array<i64: 32, 8>}, {pipeline_mode = #tpu.pipeline_mode<synchronous>, transform_indices = @transform_2, window_bounds = array<i64: 32, 1>}, {transform_indices = @transform_3, window_bounds = array<i64: 1, 128>}]} {
    %c0 = arith.constant 0 : index
    %c0_0 = arith.constant 0 : index
    %0 = vector.load %arg1[%c0, %c0_0] : memref<8x128xf32, #tpu.memory_space<vmem>>, vector<8x128xf32>
    %c0_1 = arith.constant 0 : index
    %c0_2 = arith.constant 0 : index
    %1 = vector.load %arg2[%c0_1, %c0_2] : memref<32x8xf32, #tpu.memory_space<vmem>>, vector<32x8xf32>
    %c0_3 = arith.constant 0 : index
    %c0_4 = arith.constant 0 : index
    %2 = vector.load %arg3[%c0_3, %c0_4] : memref<32x1xf32, #tpu.memory_space<vmem>>, vector<32x1xf32>
    %cst = arith.constant dense<0.000000e+00> : vector<32x128xf32>
    %3 = tpu.matmul %1, %0, %cst {dimension_numbers = #tpu.dot_dimension_numbers<[1], [0], [0], [1], [0, 0, 1, 1], [], []>} : vector<32x8xf32>, vector<8x128xf32>, vector<32x128xf32> -> vector<32x128xf32>
    %cst_5 = arith.constant 0.000000e+00 : f32
    %4 = vector.broadcast %cst_5 : f32 to vector<32x128xf32>
    %5 = arith.maximumf %3, %4 : vector<32x128xf32>
    %6 = vector.broadcast %2 : vector<32x1xf32> to vector<32x128xf32>
    %7 = arith.mulf %6, %5 : vector<32x128xf32>
    %cst_6 = arith.constant dense<0.000000e+00> : vector<128xf32>
    %8 = vector.multi_reduction <add>, %7, %cst_6 [0] : vector<32x128xf32> to vector<128xf32>
    %9 = vector.shape_cast %8 : vector<128xf32> to vector<1x128xf32>
    %c0_7 = arith.constant 0 : index
    %c0_8 = arith.constant 0 : index
    %10 = vector.load %arg4[%c0_7, %c0_8] : memref<1x128xf32, #tpu.memory_space<vmem>>, vector<1x128xf32>
    tpu.vector_store %arg4[%c0_7, %c0_8], %9 {strides = array<i32>} : memref<1x128xf32, #tpu.memory_space<vmem>>, vector<1x128xf32>,
    return
  }
  func.func @transform_0(%arg0: i32) -> (i32, i32) {
    %c0_i32 = arith.constant 0 : i32
    %c0_i32_0 = arith.constant 0 : i32
    return %c0_i32, %arg0 : i32, i32
  }
  func.func @transform_1(%arg0: i32) -> (i32, i32) {
    %c0_i32 = arith.constant 0 : i32
    %c0_i32_0 = arith.constant 0 : i32
    %c0_i32_1 = arith.constant 0 : i32
    return %c0_i32, %c0_i32_0 : i32, i32
  }
  func.func @transform_2(%arg0: i32) -> (i32, i32) {
    %c0_i32 = arith.constant 0 : i32
    %c0_i32_0 = arith.constant 0 : i32
    %c0_i32_1 = arith.constant 0 : i32
    return %c0_i32, %c0_i32_0 : i32, i32
  }
  func.func @transform_3(%arg0: i32) -> (i32, i32) {
    %c0_i32 = arith.constant 0 : i32
    %c0_i32_0 = arith.constant 0 : i32
    return %c0_i32, %arg0 : i32, i32
  }
}

</mosaic_0001>

<bundles_post_ra>
// kernel: tpu_custom_call.1
= control target key start
LH: loop header
LB: loop body
LE: loop exit
PB: predicated region body
PF: predicated region fallthrough
CT: control target
= control target key end

     0   :  { %vm24_vm0 = vcmask 64512   ;;  %v157_v6 = vmov 0   ;;  %s213_s0 = inlined_call_operand.vmem [shape: f32[8,128], index: 0, kind: input, shape index: {}]   ;;  %s214_s1 = inlined_call_operand.vmem [shape: f32[32,8], index: 1, kind: input, shape index: {}]   ;;  %s215_s2 = inlined_call_operand.vmem [shape: f32[32,1], index: 2, kind: input, shape index: {}]   ;;  %s216_s3 = inlined_call_operand.hbm [shape: f32[1,128], index: 3, kind: output, shape index: {}]  }
   0x1   :  { %v15_v0 = vld [vmem:[%s213_s0] sm:$0xff]  ;;  %v17_v2 = vld [vmem:[%s214_s1 + $0x8] sm:$0xff]  ;;  %v18_v3 = vld [vmem:[%s214_s1 + $0x10] sm:$0xff]  ;;  %129 = vset.pattern.permute.xlu0 %v157_v6 }
   0x2   :  { %v16_v1 = vld [vmem:[%s214_s1] sm:$0xff]  ;;  %52 = vmatpush.msra.mxu0 %v15_v0  ;;  %124 = vmatpush.msra.mxu1 %v15_v0  ;;  %v19_v4 = vld [vmem:[%s214_s1 + $0x18] sm:$0xff] }
   0x3   :  { %125 = vmatpush.msra.mxu2 %v15_v0  ;;  %126 = vmatpush.msra.mxu3 %v15_v0  ;;  %v20_v5 = vld [vmem:[%s215_s2] sm:$0xff] }
   0x4   :  { %120 = vmatmul.msk.f32.vlgmr.msra.gmra.mxu0 %vm24_vm0, %v16_v1 }
   0x5   :  { %8 = vsyncpa [#allocation3], 0  ;;  %121 = vmatmul.msk.f32.vlgmr.msra.gmra.mxu1 %vm24_vm0, %v17_v2  ;;  %122 = vmatmul.msk.f32.vlgmr.msra.gmra.mxu2 %vm24_vm0, %v18_v3  ;;  %v22_v7 = vld [vmem:[%s215_s2 + $0x10] sm:$0xff]  ;;  %v21_v8 = vld [vmem:[%s215_s2 + $0x8] sm:$0xff]  ;;  %s111_s4 = sshll.u32 %s216_s3, 4  ;;  %s112_s4 = int_to_ptr.hbm [resolvable:$true] %s111_s4 }
   0x6   :  { %123 = vmatmul.msk.f32.vlgmr.msra.gmra.mxu3 %vm24_vm0, %v19_v4  ;;  %72 = vperm.xlu0 %129, %v20_v5   ;;  %v23_v9 = vld [vmem:[%s215_s2 + $0x18] sm:$0xff]  ;;  %s158_s2 = smov [#allocation2]  }
   0x7   :  { %130 = vset.pattern.permute.xlu1 %v157_v6  ;;  %s109_s28 = sshll.u32 %s158_s2, 4  ;;  %s110_s28 = int_to_ptr.vmem [resolvable:$true] %s109_s28 }
   0x8   :  { %82 = vperm.xlu1 %130, %v22_v7  }
   0xe   :  { %77 = vperm.xlu0 %129, %v21_v8  }
  0x10   :  { %87 = vperm.xlu1 %130, %v23_v9  }
  0x78   :  { %v73_v10 = vpop.permute.xlu0 %72 }
  0x7a   :  { %v83_v12 = vpop.permute.xlu1 %82 }
  0x80   :  { %v78_v16 = vpop.permute.xlu0 %77 }
  0x81   :  { %v54_v11 = vpop.f32.mrf.mxu0 }
  0x82   :  { %v57_v13 = vpop.f32.mrf.mxu1  ;;  %v66_v14 = vmax.f32 %v54_v11, 0.0  ;;  %v88_v25 = vpop.permute.xlu1 %87 }
  0x83   :  { %v67_v15 = vmax.f32 %v57_v13, 0.0 }
  0x84   :  { %v90_v17 = vmul.f32 %v73_v10, %v66_v14 }
  0x85   :  { %v91_v18 = vmul.f32 %v78_v16, %v67_v15 }
  0x87   :  { %v94_v23 = vadd.f32 %v91_v18, %v90_v17 }
  0x88   :  { %v60_v19 = vpop.f32.mrf.mxu2 }
  0x89   :  { %v68_v20 = vmax.f32 %v60_v19, 0.0  ;;  %v63_v21 = vpop.f32.mrf.mxu3 }
  0x8a   :  { %v69_v22 = vmax.f32 %v63_v21, 0.0 }
  0x8b   :  { %v92_v24 = vmul.f32 %v83_v12, %v68_v20 }
  0x8c   :  { %v93_v27 = vmul.f32 %v88_v25, %v69_v22 }
  0x8d   :  { %v95_v26 = vadd.f32 %v94_v23, %v92_v24 }
  0x8f   :  { %v96_v28 = vadd.f32 %v95_v26, %v93_v27 }
  0x91   :  { %v97_v29 = vrot.slane %v96_v28, 4 }
  0x93   :  { %v98_v30 = vadd.f32 %v97_v29, %v96_v28 }
  0x95   :  { %v99_v31 = vrot.slane %v98_v30, 2 }
  0x97   :  { %v100_v32 = vadd.f32 %v99_v31, %v98_v30 }
  0x99   :  { %v101_v33 = vrot.slane %v100_v32, 1 }
  0x9b   :  { %v102_v34 = vadd.f32 %v101_v33, %v100_v32 }
  0x9d   :  { %103 = vst [vmem:[#allocation2] sm:$0x1] %v102_v34 }
  0x9e   :  { %114 = dma.vmem_to_hbm [thread:$0]  %s110_s28, 16, %s112_s4, [#allocation3]  }
  0x9f   :  { %155 = dma.done.wait [#allocation3], 16  }
  0xa0   :  { %156 = vsyncadd [#allocation3], 4294967280 }
  0xa1   :  { %119 = vsyncpa [#allocation3], 1 }

// kernel: tpu_custom_call.1
= control target key start
LH: loop header
LB: loop body
LE: loop exit
PB: predicated region body
PF: predicated region fallthrough
CT: control target
= control target key end

     0   :  { %vm24_vm0 = vcmask 64512   ;;  %v157_v6 = vmov 0   ;;  %s213_s0 = inlined_call_operand.vmem [shape: f32[8,128], index: 0, kind: input, shape index: {}]   ;;  %s214_s1 = inlined_call_operand.vmem [shape: f32[32,8], index: 1, kind: input, shape index: {}]   ;;  %s215_s2 = inlined_call_operand.vmem [shape: f32[32,1], index: 2, kind: input, shape index: {}]   ;;  %s216_s3 = inlined_call_operand.hbm [shape: f32[1,128], index: 3, kind: output, shape index: {}]  }
   0x1   :  { %v15_v0 = vld [vmem:[%s213_s0] sm:$0xff]  ;;  %v17_v2 = vld [vmem:[%s214_s1 + $0x8] sm:$0xff]  ;;  %v18_v3 = vld [vmem:[%s214_s1 + $0x10] sm:$0xff]  ;;  %129 = vset.pattern.permute.xlu0 %v157_v6 }
   0x2   :  { %v16_v1 = vld [vmem:[%s214_s1] sm:$0xff]  ;;  %52 = vmatpush.msra.mxu0 %v15_v0  ;;  %124 = vmatpush.msra.mxu1 %v15_v0  ;;  %v19_v4 = vld [vmem:[%s214_s1 + $0x18] sm:$0xff] }
   0x3   :  { %125 = vmatpush.msra.mxu2 %v15_v0  ;;  %126 = vmatpush.msra.mxu3 %v15_v0  ;;  %v20_v5 = vld [vmem:[%s215_s2] sm:$0xff] }
   0x4   :  { %120 = vmatmul.msk.f32.vlgmr.msra.gmra.mxu0 %vm24_vm0, %v16_v1 }
   0x5   :  { %8 = vsyncpa [#allocation3], 0  ;;  %121 = vmatmul.msk.f32.vlgmr.msra.gmra.mxu1 %vm24_vm0, %v17_v2  ;;  %122 = vmatmul.msk.f32.vlgmr.msra.gmra.mxu2 %vm24_vm0, %v18_v3  ;;  %v22_v7 = vld [vmem:[%s215_s2 + $0x10] sm:$0xff]  ;;  %v21_v8 = vld [vmem:[%s215_s2 + $0x8] sm:$0xff]  ;;  %s111_s4 = sshll.u32 %s216_s3, 4  ;;  %s112_s4 = int_to_ptr.hbm [resolvable:$true] %s111_s4 }
   0x6   :  { %123 = vmatmul.msk.f32.vlgmr.msra.gmra.mxu3 %vm24_vm0, %v19_v4  ;;  %72 = vperm.xlu0 %129, %v20_v5   ;;  %v23_v9 = vld [vmem:[%s215_s2 + $0x18] sm:$0xff]  ;;  %s158_s2 = smov [#allocation2]  }
   0x7   :  { %130 = vset.pattern.permute.xlu1 %v157_v6  ;;  %s109_s28 = sshll.u32 %s158_s2, 4  ;;  %s110_s28 = int_to_ptr.vmem [resolvable:$true] %s109_s28 }
   0x8   :  { %82 = vperm.xlu1 %130, %v22_v7  }
   0xe   :  { %77 = vperm.xlu0 %129, %v21_v8  }
  0x10   :  { %87 = vperm.xlu1 %130, %v23_v9  }
  0x78   :  { %v73_v10 = vpop.permute.xlu0 %72 }
  0x7a   :  { %v83_v12 = vpop.permute.xlu1 %82 }
  0x80   :  { %v78_v16 = vpop.permute.xlu0 %77 }
  0x81   :  { %v54_v11 = vpop.f32.mrf.mxu0 }
  0x82   :  { %v57_v13 = vpop.f32.mrf.mxu1  ;;  %v66_v14 = vmax.f32 %v54_v11, 0.0  ;;  %v88_v25 = vpop.permute.xlu1 %87 }
  0x83   :  { %v67_v15 = vmax.f32 %v57_v13, 0.0 }
  0x84   :  { %v90_v17 = vmul.f32 %v73_v10, %v66_v14 }
  0x85   :  { %v91_v18 = vmul.f32 %v78_v16, %v67_v15 }
  0x87   :  { %v94_v23 = vadd.f32 %v91_v18, %v90_v17 }
  0x88   :  { %v60_v19 = vpop.f32.mrf.mxu2 }
  0x89   :  { %v68_v20 = vmax.f32 %v60_v19, 0.0  ;;  %v63_v21 = vpop.f32.mrf.mxu3 }
  0x8a   :  { %v69_v22 = vmax.f32 %v63_v21, 0.0 }
  0x8b   :  { %v92_v24 = vmul.f32 %v83_v12, %v68_v20 }
  0x8c   :  { %v93_v27 = vmul.f32 %v88_v25, %v69_v22 }
  0x8d   :  { %v95_v26 = vadd.f32 %v94_v23, %v92_v24 }
  0x8f   :  { %v96_v28 = vadd.f32 %v95_v26, %v93_v27 }
  0x91   :  { %v97_v29 = vrot.slane %v96_v28, 4 }
  0x93   :  { %v98_v30 = vadd.f32 %v97_v29, %v96_v28 }
  0x95   :  { %v99_v31 = vrot.slane %v98_v30, 2 }
  0x97   :  { %v100_v32 = vadd.f32 %v99_v31, %v98_v30 }
  0x99   :  { %v101_v33 = vrot.slane %v100_v32, 1 }
  0x9b   :  { %v102_v34 = vadd.f32 %v101_v33, %v100_v32 }
  0x9d   :  { %103 = vst [vmem:[#allocation2] sm:$0x1] %v102_v34 }
  0x9e   :  { %114 = dma.vmem_to_hbm [thread:$0]  %s110_s28, 16, %s112_s4, [#allocation3]  }
  0x9f   :  { %155 = dma.done.wait [#allocation3], 16  }
  0xa0   :  { %156 = vsyncadd [#allocation3], 4294967280 }
  0xa1   :  { %119 = vsyncpa [#allocation3], 1 }

</bundles_post_ra>
